<compile_context>
chip_gen: v5e
topology: v5e:2x2
jax: 0.10.0
libtpu: 0.0.40
codegen_flags: <defaults>
</compile_context>

<pallas_src>
import jax
import jax.numpy as jnp
from jax.experimental import pallas as pl
from jax.experimental.pallas import tpu as pltpu


def ast_kernel(adj_ref, a2_ref, a3_ref, o_ref):
    # Fused weighted combination, computed in f32 and cast to the output dtype.
    adj = adj_ref[...].astype(jnp.float32)
    a2 = a2_ref[...].astype(jnp.float32)
    a3 = a3_ref[...].astype(jnp.float32)
    o_ref[...] = (0.1 * adj + 0.2 * a2 + 0.7 * a3).astype(o_ref.dtype)


def _chip_profile():
    """(vmem_capacity_bytes, num_tensorcores) with conservative fallbacks."""
    vmem_cap = 128 * 1024 * 1024
    num_cores = 1
    try:
        info = pltpu.get_tpu_info()
        vmem_cap = int(getattr(info, "vmem_capacity_bytes", vmem_cap))
    except Exception:
        pass
    try:
        kind = jax.devices()[0].device_kind.lower()
        if "v7" in kind:
            num_cores = 2
    except Exception:
        pass
    # v7x exposes 64 MiB VMEM per TensorCore and has 2 TCs per chip.
    if vmem_cap <= 64 * 1024 * 1024:
        num_cores = max(num_cores, 2)
    return vmem_cap, num_cores


def _pick_row_tile(total_rows, quantum, bytes_per_row, vmem_budget_bytes, num_cores):
    """Largest sublane-aligned row tile that fits the (double-buffered) budget.

    On 2-TC chips, prefer an even number of grid steps so both TensorCores
    get equal work; on 1-TC chips prefer the fewest (largest) steps.
    """
    max_rows = vmem_budget_bytes // max(bytes_per_row, 1)
    max_rows = max(quantum, (max_rows // quantum) * quantum)

    if total_rows <= max_rows:
        # Everything fits in one step; split in two only to feed 2 TCs.
        if num_cores >= 2 and total_rows > quantum:
            half = (total_rows + 1) // 2
            half = ((half + quantum - 1) // quantum) * quantum
            return min(half, total_rows)
        return total_rows

    rows_tile = max_rows
    if num_cores >= 2:
        grid = -(-total_rows // rows_tile)
        if grid % 2:
            alt = -(-total_rows // (grid + 1))
            alt = ((alt + quantum - 1) // quantum) * quantum
            if quantum <= alt <= max_rows and (-(-total_rows // alt)) % 2 == 0:
                rows_tile = alt
    return rows_tile


def ast_model(adj, A2, A3, A4=None, A5=None):
    # A4 / A5 are accepted for signature parity but unused, exactly as in the
    # original PyTorch forward.
    assert adj.shape == A2.shape == A3.shape
    B, N, M = adj.shape
    R = B * N

    # PyTorch promotion: `0.1 * x` is floating; promote to at least float32.
    promoted = jnp.promote_types(jnp.promote_types(adj.dtype, A2.dtype), A3.dtype)
    out_dtype = promoted if jnp.issubdtype(promoted, jnp.floating) else jnp.float32

    itemsizes = [jnp.dtype(a.dtype).itemsize for a in (adj, A2, A3)]
    out_itemsize = jnp.dtype(out_dtype).itemsize
    # Sublane packing quantum: 8 for 4-byte, 16 for 2-byte, 32 for 1-byte.
    quantum = max(8, 32 // min(itemsizes + [out_itemsize]))

    vmem_cap, num_cores = _chip_profile()
    # One budget drives both the tile picker and the compiler's VMEM limit.
    budget = max(8 << 20, (vmem_cap * 3) // 8)          # ~48 MiB v5e/v6e, ~24 MiB v7x
    vmem_limit = min(budget + (16 << 20), max(vmem_cap - (16 << 20), budget))

    # Double-buffered footprint per row for 3 inputs + 1 output.
    bytes_per_row = 2 * M * (sum(itemsizes) + out_itemsize)
    rows_tile = _pick_row_tile(R, quantum, bytes_per_row, budget, num_cores)
    grid = (pl.cdiv(R, rows_tile),)

    # 3 muls + 2 adds per element; 3 inputs read + 1 output written.
    cost = pl.CostEstimate(
        flops=5 * R * M,
        transcendentals=0,
        bytes_accessed=R * M * (sum(itemsizes) + out_itemsize),
    )

    def idx(i):
        return (i, 0)

    block_in_bytes = rows_tile * M * max(itemsizes)
    if grid[0] >= 3 and block_in_bytes < (1 << 20):
        # Tiny blocks: pipeline is DMA-issue/latency exposed; add a 3rd buffer.
        in_specs = [
            pl.BlockSpec((rows_tile, M), idx, pipeline_mode=pl.Buffered(3))
            for _ in range(3)
        ]
    else:
        in_specs = [pl.BlockSpec((rows_tile, M), idx) for _ in range(3)]
    out_spec = pl.BlockSpec((rows_tile, M), idx)

    out = pl.pallas_call(
        ast_kernel,
        out_shape=jax.ShapeDtypeStruct((R, M), out_dtype),
        grid_spec=pltpu.PrefetchScalarGridSpec(
            num_scalar_prefetch=0,
            grid=grid,
            in_specs=in_specs,
            out_specs=out_spec,
        ),
        compiler_params=pltpu.CompilerParams(
            dimension_semantics=("parallel",),
            vmem_limit_bytes=int(vmem_limit),
        ),
        cost_estimate=cost,
    )(adj.reshape(R, M), A2.reshape(R, M), A3.reshape(R, M))

    return out.reshape(B, N, M)


def reference(adj, A2, A3, A4=None, A5=None):
    return 0.1 * adj + 0.2 * A2 + 0.7 * A3


if __name__ == "__main__":
    # Small shapes consistent with the forward: five batched adjacency-like
    # matrices of shape (B, N, N). N=128 keeps the last dim lane-dense.
    B, N = 4, 128

    key = jax.random.PRNGKey(0)
    k1, k2, k3, k4, k5 = jax.random.split(key, 5)
    adj = jax.random.uniform(k1, (B, N, N), dtype=jnp.float32)
    A2 = jax.random.uniform(k2, (B, N, N), dtype=jnp.float32)
    A3 = jax.random.uniform(k3, (B, N, N), dtype=jnp.float32)
    A4 = jax.random.uniform(k4, (B, N, N), dtype=jnp.float32)  # unused, as in PyTorch
    A5 = jax.random.uniform(k5, (B, N, N), dtype=jnp.float32)  # unused, as in PyTorch

    out = ast_model(adj, A2, A3, A4, A5)
    out = jax.block_until_ready(out)

    ref = reference(adj, A2, A3)
    assert out.shape == (B, N, N)
    assert out.dtype == jnp.float32
    assert jnp.allclose(out, ref, atol=1e-5, rtol=1e-5), "mismatch vs reference"

    print("KERNEL_OK")
</pallas_src>

<mosaic_0001>
module attributes {stable_mosaic.version = 11 : i64} {
  func.func @ast_kernel(%arg0: i32, %arg1: memref<512x128xf32, #tpu.memory_space<vmem>>, %arg2: memref<512x128xf32, #tpu.memory_space<vmem>>, %arg3: memref<512x128xf32, #tpu.memory_space<vmem>>, %arg4: memref<512x128xf32, #tpu.memory_space<vmem>>) attributes {dimension_semantics = [#tpu.dimension_semantics<parallel>], iteration_bounds = array<i64: 1>, scalar_prefetch = 0 : i64, scratch_operands = 0 : i64, tpu.core_type = #tpu.core_type<tc>, window_params = [{transform_indices = @transform_0, window_bounds = array<i64: 512, 128>}, {transform_indices = @transform_1, window_bounds = array<i64: 512, 128>}, {transform_indices = @transform_2, window_bounds = array<i64: 512, 128>}, {transform_indices = @transform_3, window_bounds = array<i64: 512, 128>}]} {
    %c0 = arith.constant 0 : index
    %c0_0 = arith.constant 0 : index
    %0 = vector.load %arg1[%c0, %c0_0] : memref<512x128xf32, #tpu.memory_space<vmem>>, vector<512x128xf32>
    %c0_1 = arith.constant 0 : index
    %c0_2 = arith.constant 0 : index
    %1 = vector.load %arg2[%c0_1, %c0_2] : memref<512x128xf32, #tpu.memory_space<vmem>>, vector<512x128xf32>
    %c0_3 = arith.constant 0 : index
    %c0_4 = arith.constant 0 : index
    %2 = vector.load %arg3[%c0_3, %c0_4] : memref<512x128xf32, #tpu.memory_space<vmem>>, vector<512x128xf32>
    %cst = arith.constant 1.000000e-01 : f32
    %3 = vector.broadcast %cst : f32 to vector<512x128xf32>
    %4 = arith.mulf %3, %0 : vector<512x128xf32>
    %cst_5 = arith.constant 2.000000e-01 : f32
    %5 = vector.broadcast %cst_5 : f32 to vector<512x128xf32>
    %6 = arith.mulf %5, %1 : vector<512x128xf32>
    %7 = arith.addf %4, %6 : vector<512x128xf32>
    %cst_6 = arith.constant 0.699999988 : f32
    %8 = vector.broadcast %cst_6 : f32 to vector<512x128xf32>
    %9 = arith.mulf %8, %2 : vector<512x128xf32>
    %10 = arith.addf %7, %9 : vector<512x128xf32>
    %c0_7 = arith.constant 0 : index
    %c0_8 = arith.constant 0 : index
    %11 = vector.load %arg4[%c0_7, %c0_8] : memref<512x128xf32, #tpu.memory_space<vmem>>, vector<512x128xf32>
    tpu.vector_store %arg4[%c0_7, %c0_8], %10 {strides = array<i32>} : memref<512x128xf32, #tpu.memory_space<vmem>>, vector<512x128xf32>,
    return
  }
  func.func @transform_0(%arg0: i32) -> (i32, i32) {
    %c0_i32 = arith.constant 0 : i32
    %c0_i32_0 = arith.constant 0 : i32
    return %arg0, %c0_i32 : i32, i32
  }
  func.func @transform_1(%arg0: i32) -> (i32, i32) {
    %c0_i32 = arith.constant 0 : i32
    %c0_i32_0 = arith.constant 0 : i32
    return %arg0, %c0_i32 : i32, i32
  }
  func.func @transform_2(%arg0: i32) -> (i32, i32) {
    %c0_i32 = arith.constant 0 : i32
    %c0_i32_0 = arith.constant 0 : i32
    return %arg0, %c0_i32 : i32, i32
  }
  func.func @transform_3(%arg0: i32) -> (i32, i32) {
    %c0_i32 = arith.constant 0 : i32
    %c0_i32_0 = arith.constant 0 : i32
    return %arg0, %c0_i32 : i32, i32
  }
}

</mosaic_0001>

<bundles_post_ra>
// kernel: tpu_custom_call.1
= control target key start
LH: loop header
LB: loop body
LE: loop exit
PB: predicated region body
PF: predicated region fallthrough
CT: control target
= control target key end

     0   :  { %8 = vsyncpa [#allocation3], 0  ;;  %s816_s0 = inlined_call_operand.hbm [shape: f32[512,128], index: 0, kind: input, shape index: {}]   ;;  %s817_s1 = inlined_call_operand.hbm [shape: f32[512,128], index: 1, kind: input, shape index: {}]   ;;  %s818_s2 = inlined_call_operand.hbm [shape: f32[512,128], index: 2, kind: input, shape index: {}]   ;;  %s819_s3 = inlined_call_operand.hbm [shape: f32[512,128], index: 3, kind: output, shape index: {}]  }
   0x1   :  { %9 = vsyncpa [#allocation6], 0 }
   0x2   :  { %10 = vsyncpa [#allocation4], 0  ;;  %s28_s14 = sshll.u32 %s817_s1, 4  ;;  %s766_s15 = smov [#allocation5]   ;;  %s29_s14 = int_to_ptr.hbm [resolvable:$true] %s28_s14 }
   0x3   :  { %s30_s16 = sshll.u32 %s766_s15, 4  ;;  %s15_s19 = sshll.u32 %s816_s0, 4  ;;  %s31_s16 = int_to_ptr.vmem [resolvable:$true] %s30_s16  ;;  %s16_s19 = int_to_ptr.hbm [resolvable:$true] %s15_s19 }
   0x4   :  { %s767_s20 = smov 128   ;;  %s768_s21 = smov 8  }
   0x5   :  { %36 = dma.hbm_to_vmem [thread:$0]  %s29_s14, 8192, %s31_s16, [#allocation6], %s767_s20, %s767_s20, %s768_s21  }
   0x6   :  { %s769_s22 = smov [#allocation2]   ;;  %s41_s1 = sshll.u32 %s818_s2, 4  ;;  %s42_s1 = int_to_ptr.hbm [resolvable:$true] %s41_s1 }
   0x7   :  { %s17_s23 = sshll.u32 %s769_s22, 4  ;;  %s770_s0 = smov [#allocation7]   ;;  %s18_s23 = int_to_ptr.vmem [resolvable:$true] %s17_s23 }
   0x8   :  { %23 = dma.hbm_to_vmem [thread:$0]  %s16_s19, 8192, %s18_s23, [#allocation3], %s767_s20, %s767_s20, %s768_s21  }
   0x9   :  { %s43_s26 = sshll.u32 %s770_s0, 4  ;;  %s44_s26 = int_to_ptr.vmem [resolvable:$true] %s43_s26 }
   0xa   :  { %49 = dma.hbm_to_vmem [thread:$0]  %s42_s1, 8192, %s44_s26, [#allocation6], %s767_s20, %s767_s20, %s768_s21  }
   0xb   :  { %760 = dma.done.wait [#allocation3], 8192  }
   0xc   :  { %761 = vsyncadd [#allocation3], 4294959104 }
   0xd   :  { %762 = dma.done.wait [#allocation6], 16384  }
   0xe   :  { %763 = vsyncadd [#allocation6], 4294950912  ;;  %v62_v0 = vld [vmem:[#allocation2] sm:$0xff]  ;;  %v63_v6 = vld [vmem:[#allocation2 + $0x8] sm:$0xff]  ;;  %s771_s2 = smov [#allocation8]   ;;  %s644_s30 = sshll.u32 %s819_s3, 4  ;;  %s645_s30 = int_to_ptr.hbm [resolvable:$true] %s644_s30 }
   0xf   :  { %v126_v1 = vld [vmem:[#allocation5] sm:$0xff]  ;;  %v254_v3 = vmul.f32 0.1, %v62_v0  ;;  %v127_v7 = vld [vmem:[#allocation5 + $0x8] sm:$0xff]  ;;  %v255_v10 = vmul.f32 0.1, %v63_v6 }
  0x10   :  { %v190_v2 = vld [vmem:[#allocation7] sm:$0xff]  ;;  %v318_v4 = vmul.f32 0.2, %v126_v1  ;;  %v191_v8 = vld [vmem:[#allocation7 + $0x8] sm:$0xff]  ;;  %v319_v11 = vmul.f32 0.2, %v127_v7 }
  0x11   :  { %v446_v5 = vmul.f32 0.7, %v190_v2  ;;  %v447_v12 = vmul.f32 0.7, %v191_v8  ;;  %v64_v13 = vld [vmem:[#allocation2 + $0x10] sm:$0xff]  ;;  %v65_v20 = vld [vmem:[#allocation2 + $0x18] sm:$0xff] }
  0x12   :  { %v382_v9 = vadd.f32 %v318_v4, %v254_v3  ;;  %v128_v14 = vld [vmem:[#allocation5 + $0x10] sm:$0xff]  ;;  %v383_v17 = vadd.f32 %v319_v11, %v255_v10  ;;  %v256_v18 = vmul.f32 0.1, %v64_v13  ;;  %v129_v21 = vld [vmem:[#allocation5 + $0x18] sm:$0xff]  ;;  %v257_v24 = vmul.f32 0.1, %v65_v20 }
  0x13   :  { %v192_v15 = vld [vmem:[#allocation7 + $0x10] sm:$0xff]  ;;  %v320_v19 = vmul.f32 0.2, %v128_v14  ;;  %v193_v23 = vld [vmem:[#allocation7 + $0x18] sm:$0xff]  ;;  %v66_v25 = vld [vmem:[#allocation2 + $0x20] sm:$0xff]  ;;  %s642_s27 = sshll.u32 %s771_s2, 4  ;;  %s643_s27 = int_to_ptr.vmem [resolvable:$true] %s642_s27 }
  0x14   :  { %v510_v16 = vadd.f32 %v446_v5, %v382_v9  ;;  %v448_v22 = vmul.f32 0.7, %v192_v15  ;;  %v511_v26 = vadd.f32 %v447_v12, %v383_v17  ;;  %v321_v28 = vmul.f32 0.2, %v129_v21  ;;  %v130_v30 = vld [vmem:[#allocation5 + $0x20] sm:$0xff]  ;;  %v67_v34 = vld [vmem:[#allocation2 + $0x28] sm:$0xff] }
  0x15   :  { %v384_v27 = vadd.f32 %v320_v19, %v256_v18  ;;  %v449_v29 = vmul.f32 0.7, %v193_v23  ;;  %v194_v31 = vld [vmem:[#allocation7 + $0x20] sm:$0xff]  ;;  %v258_v32 = vmul.f32 0.1, %v66_v25  ;;  %v131_v38 = vld [vmem:[#allocation5 + $0x28] sm:$0xff] }
  0x16   :  { %574 = vst [vmem:[#allocation8] sm:$0xff] %v510_v16  ;;  %v322_v33 = vmul.f32 0.2, %v130_v30  ;;  %v385_v36 = vadd.f32 %v321_v28, %v257_v24  ;;  %v450_v37 = vmul.f32 0.7, %v194_v31  ;;  %v195_v39 = vld [vmem:[#allocation7 + $0x28] sm:$0xff] }
  0x17   :  { %575 = vst [vmem:[#allocation8 + $0x8] sm:$0xff] %v511_v26  ;;  %v512_v35 = vadd.f32 %v448_v22, %v384_v27  ;;  %v68_v40 = vld [vmem:[#allocation2 + $0x30] sm:$0xff]  ;;  %v259_v42 = vmul.f32 0.1, %v67_v34  ;;  %v323_v43 = vmul.f32 0.2, %v131_v38 }
  0x18   :  { %v386_v41 = vadd.f32 %v322_v33, %v258_v32  ;;  %v451_v44 = vmul.f32 0.7, %v195_v39  ;;  %v513_v45 = vadd.f32 %v449_v29, %v385_v36  ;;  %v132_v46 = vld [vmem:[#allocation5 + $0x30] sm:$0xff]  ;;  %v260_v48 = vmul.f32 0.1, %v68_v40  ;;  %v69_v49 = vld [vmem:[#allocation2 + $0x38] sm:$0xff] }
  0x19   :  { %576 = vst [vmem:[#allocation8 + $0x10] sm:$0xff] %v512_v35  ;;  %v196_v47 = vld [vmem:[#allocation7 + $0x30] sm:$0xff]  ;;  %v387_v51 = vadd.f32 %v323_v43, %v259_v42  ;;  %v324_v52 = vmul.f32 0.2, %v132_v46  ;;  %v133_v54 = vld [vmem:[#allocation5 + $0x38] sm:$0xff]  ;;  %v70_v58 = vld [vmem:[#allocation2 + $0x40] sm:$0xff] }
  0x1a   :  { %v514_v50 = vadd.f32 %v450_v37, %v386_v41  ;;  %v452_v53 = vmul.f32 0.7, %v196_v47  ;;  %v197_v55 = vld [vmem:[#allocation7 + $0x38] sm:$0xff]  ;;  %577 = vst [vmem:[#allocation8 + $0x18] sm:$0xff] %v513_v45  ;;  %v261_v56 = vmul.f32 0.1, %v69_v49 }
  0x1b   :  { %v325_v57 = vmul.f32 0.2, %v133_v54  ;;  %v515_v59 = vadd.f32 %v451_v44, %v387_v51  ;;  %v388_v60 = vadd.f32 %v324_v52, %v260_v48  ;;  %v453_v61 = vmul.f32 0.7, %v197_v55  ;;  %v134_v62 = vld [vmem:[#allocation5 + $0x40] sm:$0xff]  ;;  %v71_v0 = vld [vmem:[#allocation2 + $0x48] sm:$0xff] }
  0x1c   :  { %578 = vst [vmem:[#allocation8 + $0x20] sm:$0xff] %v514_v50  ;;  %v198_v63 = vld [vmem:[#allocation7 + $0x40] sm:$0xff]  ;;  %v262_v2 = vmul.f32 0.1, %v70_v58  ;;  %v326_v3 = vmul.f32 0.2, %v134_v62 }
  0x1d   :  { %v389_v1 = vadd.f32 %v325_v57, %v261_v56  ;;  %v454_v4 = vmul.f32 0.7, %v198_v63  ;;  %579 = vst [vmem:[#allocation8 + $0x28] sm:$0xff] %v515_v59  ;;  %v516_v5 = vadd.f32 %v452_v53, %v388_v60  ;;  %v135_v6 = vld [vmem:[#allocation5 + $0x48] sm:$0xff]  ;;  %v263_v8 = vmul.f32 0.1, %v71_v0 }
  0x1e   :  { %v199_v7 = vld [vmem:[#allocation7 + $0x48] sm:$0xff]  ;;  %v72_v9 = vld [vmem:[#allocation2 + $0x50] sm:$0xff]  ;;  %v390_v11 = vadd.f32 %v326_v3, %v262_v2  ;;  %v327_v12 = vmul.f32 0.2, %v135_v6  ;;  %v73_v18 = vld [vmem:[#allocation2 + $0x58] sm:$0xff] }
  0x1f   :  { %v517_v10 = vadd.f32 %v453_v61, %v389_v1  ;;  %v455_v13 = vmul.f32 0.7, %v199_v7  ;;  %v136_v14 = vld [vmem:[#allocation5 + $0x50] sm:$0xff]  ;;  %580 = vst [vmem:[#allocation8 + $0x30] sm:$0xff] %v516_v5  ;;  %v264_v16 = vmul.f32 0.1, %v72_v9 }
  0x20   :  { %v200_v15 = vld [vmem:[#allocation7 + $0x50] sm:$0xff]  ;;  %v328_v17 = vmul.f32 0.2, %v136_v14  ;;  %v518_v19 = vadd.f32 %v454_v4, %v390_v11  ;;  %v391_v20 = vadd.f32 %v327_v12, %v263_v8  ;;  %v137_v22 = vld [vmem:[#allocation5 + $0x58] sm:$0xff]  ;;  %v74_v24 = vld [vmem:[#allocation2 + $0x60] sm:$0xff] }
  0x21   :  { %581 = vst [vmem:[#allocation8 + $0x38] sm:$0xff] %v517_v10  ;;  %v456_v21 = vmul.f32 0.7, %v200_v15  ;;  %v201_v23 = vld [vmem:[#allocation7 + $0x58] sm:$0xff]  ;;  %v265_v26 = vmul.f32 0.1, %v73_v18 }
  0x22   :  { %v392_v25 = vadd.f32 %v328_v17, %v264_v16  ;;  %v329_v27 = vmul.f32 0.2, %v137_v22  ;;  %v457_v28 = vmul.f32 0.7, %v201_v23  ;;  %582 = vst [vmem:[#allocation8 + $0x40] sm:$0xff] %v518_v19  ;;  %v519_v29 = vadd.f32 %v455_v13, %v391_v20  ;;  %v138_v30 = vld [vmem:[#allocation5 + $0x60] sm:$0xff] }
  0x23   :  { %v202_v31 = vld [vmem:[#allocation7 + $0x60] sm:$0xff]  ;;  %v266_v32 = vmul.f32 0.1, %v74_v24  ;;  %v75_v33 = vld [vmem:[#allocation2 + $0x68] sm:$0xff]  ;;  %v330_v36 = vmul.f32 0.2, %v138_v30 }
  0x24   :  { %v520_v34 = vadd.f32 %v456_v21, %v392_v25  ;;  %v393_v35 = vadd.f32 %v329_v27, %v265_v26  ;;  %v458_v37 = vmul.f32 0.7, %v202_v31  ;;  %v139_v38 = vld [vmem:[#allocation5 + $0x68] sm:$0xff]  ;;  %583 = vst [vmem:[#allocation8 + $0x48] sm:$0xff] %v519_v29  ;;  %v267_v40 = vmul.f32 0.1, %v75_v33 }
  0x25   :  { %v203_v39 = vld [vmem:[#allocation7 + $0x68] sm:$0xff]  ;;  %v331_v41 = vmul.f32 0.2, %v139_v38  ;;  %v76_v42 = vld [vmem:[#allocation2 + $0x70] sm:$0xff]  ;;  %v394_v44 = vadd.f32 %v330_v36, %v266_v32  ;;  %v77_v48 = vld [vmem:[#allocation2 + $0x78] sm:$0xff] }
  0x26   :  { %584 = vst [vmem:[#allocation8 + $0x50] sm:$0xff] %v520_v34  ;;  %v521_v43 = vadd.f32 %v457_v28, %v393_v35  ;;  %v459_v45 = vmul.f32 0.7, %v203_v39  ;;  %v140_v46 = vld [vmem:[#allocation5 + $0x70] sm:$0xff]  ;;  %v268_v50 = vmul.f32 0.1, %v76_v42 }
  0x27   :  { %v204_v47 = vld [vmem:[#allocation7 + $0x70] sm:$0xff]  ;;  %v395_v49 = vadd.f32 %v331_v41, %v267_v40  ;;  %v332_v51 = vmul.f32 0.2, %v140_v46  ;;  %v522_v53 = vadd.f32 %v458_v37, %v394_v44  ;;  %v141_v54 = vld [vmem:[#allocation5 + $0x78] sm:$0xff]  ;;  %v269_v56 = vmul.f32 0.1, %v77_v48 }
  0x28   :  { %v460_v52 = vmul.f32 0.7, %v204_v47  ;;  %585 = vst [vmem:[#allocation8 + $0x58] sm:$0xff] %v521_v43  ;;  %v205_v55 = vld [vmem:[#allocation7 + $0x78] sm:$0xff]  ;;  %v78_v57 = vld [vmem:[#allocation2 + $0x80] sm:$0xff]  ;;  %v79_v2 = vld [vmem:[#allocation2 + $0x88] sm:$0xff] }
  0x29   :  { %v523_v58 = vadd.f32 %v459_v45, %v395_v49  ;;  %v396_v59 = vadd.f32 %v332_v51, %v268_v50  ;;  %v333_v60 = vmul.f32 0.2, %v141_v54  ;;  %v461_v61 = vmul.f32 0.7, %v205_v55  ;;  %v142_v62 = vld [vmem:[#allocation5 + $0x80] sm:$0xff]  ;;  %586 = vst [vmem:[#allocation8 + $0x60] sm:$0xff] %v522_v53 }
  0x2a   :  { %v206_v63 = vld [vmem:[#allocation7 + $0x80] sm:$0xff]  ;;  %v270_v0 = vmul.f32 0.1, %v78_v57  ;;  %v334_v1 = vmul.f32 0.2, %v142_v62  ;;  %v143_v6 = vld [vmem:[#allocation5 + $0x88] sm:$0xff] }
  0x2b   :  { %587 = vst [vmem:[#allocation8 + $0x68] sm:$0xff] %v523_v58  ;;  %v524_v3 = vadd.f32 %v460_v52, %v396_v59  ;;  %v397_v4 = vadd.f32 %v333_v60, %v269_v56  ;;  %v462_v5 = vmul.f32 0.7, %v206_v63  ;;  %v207_v7 = vld [vmem:[#allocation7 + $0x88] sm:$0xff]  ;;  %v80_v8 = vld [vmem:[#allocation2 + $0x90] sm:$0xff]  ;;  %v81_v17 = vld [vmem:[#allocation2 + $0x98] sm:$0xff] }
  0x2c   :  { %v398_v9 = vadd.f32 %v334_v1, %v270_v0  ;;  %v271_v10 = vmul.f32 0.1, %v79_v2  ;;  %v335_v11 = vmul.f32 0.2, %v143_v6  ;;  %v463_v12 = vmul.f32 0.7, %v207_v7 }
  0x2d   :  { %588 = vst [vmem:[#allocation8 + $0x70] sm:$0xff] %v524_v3  ;;  %v525_v13 = vadd.f32 %v461_v61, %v397_v4  ;;  %v144_v14 = vld [vmem:[#allocation5 + $0x90] sm:$0xff]  ;;  %v272_v16 = vmul.f32 0.1, %v80_v8  ;;  %v145_v22 = vld [vmem:[#allocation5 + $0x98] sm:$0xff]  ;;  %v82_v26 = vld [vmem:[#allocation2 + $0xa0] sm:$0xff] }
  0x2e   :  { %v208_v15 = vld [vmem:[#allocation7 + $0x90] sm:$0xff]  ;;  %v526_v18 = vadd.f32 %v462_v5, %v398_v9  ;;  %v399_v19 = vadd.f32 %v335_v11, %v271_v10  ;;  %v336_v20 = vmul.f32 0.2, %v144_v14  ;;  %v209_v23 = vld [vmem:[#allocation7 + $0x98] sm:$0xff]  ;;  %v273_v24 = vmul.f32 0.1, %v81_v17 }
  0x2f   :  { %v464_v21 = vmul.f32 0.7, %v208_v15  ;;  %589 = vst [vmem:[#allocation8 + $0x78] sm:$0xff] %v525_v13  ;;  %v337_v25 = vmul.f32 0.2, %v145_v22  ;;  %v146_v30 = vld [vmem:[#allocation5 + $0xa0] sm:$0xff] }
  0x30   :  { %590 = vst [vmem:[#allocation8 + $0x80] sm:$0xff] %v526_v18  ;;  %v527_v27 = vadd.f32 %v463_v12, %v399_v19  ;;  %v400_v28 = vadd.f32 %v336_v20, %v272_v16  ;;  %v465_v29 = vmul.f32 0.7, %v209_v23  ;;  %v210_v31 = vld [vmem:[#allocation7 + $0xa0] sm:$0xff]  ;;  %v83_v32 = vld [vmem:[#allocation2 + $0xa8] sm:$0xff]  ;;  %v84_v41 = vld [vmem:[#allocation2 + $0xb0] sm:$0xff] }
  0x31   :  { %v401_v33 = vadd.f32 %v337_v25, %v273_v24  ;;  %v274_v34 = vmul.f32 0.1, %v82_v26  ;;  %v338_v35 = vmul.f32 0.2, %v146_v30  ;;  %v466_v36 = vmul.f32 0.7, %v210_v31 }
  0x32   :  { %591 = vst [vmem:[#allocation8 + $0x88] sm:$0xff] %v527_v27  ;;  %v528_v37 = vadd.f32 %v464_v21, %v400_v28  ;;  %v147_v38 = vld [vmem:[#allocation5 + $0xa8] sm:$0xff]  ;;  %v275_v40 = vmul.f32 0.1, %v83_v32  ;;  %v148_v46 = vld [vmem:[#allocation5 + $0xb0] sm:$0xff]  ;;  %v85_v50 = vld [vmem:[#allocation2 + $0xb8] sm:$0xff] }
  0x33   :  { %v211_v39 = vld [vmem:[#allocation7 + $0xa8] sm:$0xff]  ;;  %v529_v42 = vadd.f32 %v465_v29, %v401_v33  ;;  %v402_v43 = vadd.f32 %v338_v35, %v274_v34  ;;  %v339_v44 = vmul.f32 0.2, %v147_v38  ;;  %v212_v47 = vld [vmem:[#allocation7 + $0xb0] sm:$0xff]  ;;  %v276_v48 = vmul.f32 0.1, %v84_v41 }
  0x34   :  { %v467_v45 = vmul.f32 0.7, %v211_v39  ;;  %592 = vst [vmem:[#allocation8 + $0x90] sm:$0xff] %v528_v37  ;;  %v340_v49 = vmul.f32 0.2, %v148_v46  ;;  %v149_v54 = vld [vmem:[#allocation5 + $0xb8] sm:$0xff] }
  0x35   :  { %593 = vst [vmem:[#allocation8 + $0x98] sm:$0xff] %v529_v42  ;;  %v530_v51 = vadd.f32 %v466_v36, %v402_v43  ;;  %v403_v52 = vadd.f32 %v339_v44, %v275_v40  ;;  %v468_v53 = vmul.f32 0.7, %v212_v47  ;;  %v213_v55 = vld [vmem:[#allocation7 + $0xb8] sm:$0xff]  ;;  %v86_v56 = vld [vmem:[#allocation2 + $0xc0] sm:$0xff]  ;;  %v87_v1 = vld [vmem:[#allocation2 + $0xc8] sm:$0xff] }
  0x36   :  { %v404_v57 = vadd.f32 %v340_v49, %v276_v48  ;;  %v277_v58 = vmul.f32 0.1, %v85_v50  ;;  %v341_v59 = vmul.f32 0.2, %v149_v54  ;;  %v469_v60 = vmul.f32 0.7, %v213_v55 }
  0x37   :  { %594 = vst [vmem:[#allocation8 + $0xa0] sm:$0xff] %v530_v51  ;;  %v531_v61 = vadd.f32 %v467_v45, %v403_v52  ;;  %v150_v62 = vld [vmem:[#allocation5 + $0xc0] sm:$0xff]  ;;  %v278_v0 = vmul.f32 0.1, %v86_v56  ;;  %v151_v6 = vld [vmem:[#allocation5 + $0xc8] sm:$0xff]  ;;  %v88_v10 = vld [vmem:[#allocation2 + $0xd0] sm:$0xff] }
  0x38   :  { %v214_v63 = vld [vmem:[#allocation7 + $0xc0] sm:$0xff]  ;;  %v532_v2 = vadd.f32 %v468_v53, %v404_v57  ;;  %v405_v3 = vadd.f32 %v341_v59, %v277_v58  ;;  %v342_v4 = vmul.f32 0.2, %v150_v62  ;;  %v215_v7 = vld [vmem:[#allocation7 + $0xc8] sm:$0xff]  ;;  %v279_v8 = vmul.f32 0.1, %v87_v1 }
  0x39   :  { %v470_v5 = vmul.f32 0.7, %v214_v63  ;;  %595 = vst [vmem:[#allocation8 + $0xa8] sm:$0xff] %v531_v61  ;;  %v343_v9 = vmul.f32 0.2, %v151_v6  ;;  %v152_v14 = vld [vmem:[#allocation5 + $0xd0] sm:$0xff] }
  0x3a   :  { %596 = vst [vmem:[#allocation8 + $0xb0] sm:$0xff] %v532_v2  ;;  %v533_v11 = vadd.f32 %v469_v60, %v405_v3  ;;  %v406_v12 = vadd.f32 %v342_v4, %v278_v0  ;;  %v471_v13 = vmul.f32 0.7, %v215_v7  ;;  %v216_v15 = vld [vmem:[#allocation7 + $0xd0] sm:$0xff]  ;;  %v89_v16 = vld [vmem:[#allocation2 + $0xd8] sm:$0xff]  ;;  %v90_v25 = vld [vmem:[#allocation2 + $0xe0] sm:$0xff] }
  0x3b   :  { %v407_v17 = vadd.f32 %v343_v9, %v279_v8  ;;  %v280_v18 = vmul.f32 0.1, %v88_v10  ;;  %v344_v19 = vmul.f32 0.2, %v152_v14  ;;  %v472_v20 = vmul.f32 0.7, %v216_v15 }
  0x3c   :  { %597 = vst [vmem:[#allocation8 + $0xb8] sm:$0xff] %v533_v11  ;;  %v534_v21 = vadd.f32 %v470_v5, %v406_v12  ;;  %v153_v22 = vld [vmem:[#allocation5 + $0xd8] sm:$0xff]  ;;  %v281_v24 = vmul.f32 0.1, %v89_v16  ;;  %v154_v30 = vld [vmem:[#allocation5 + $0xe0] sm:$0xff]  ;;  %v91_v34 = vld [vmem:[#allocation2 + $0xe8] sm:$0xff] }
  0x3d   :  { %v217_v23 = vld [vmem:[#allocation7 + $0xd8] sm:$0xff]  ;;  %v535_v26 = vadd.f32 %v471_v13, %v407_v17  ;;  %v408_v27 = vadd.f32 %v344_v19, %v280_v18  ;;  %v345_v28 = vmul.f32 0.2, %v153_v22  ;;  %v218_v31 = vld [vmem:[#allocation7 + $0xe0] sm:$0xff]  ;;  %v282_v32 = vmul.f32 0.1, %v90_v25 }
  0x3e   :  { %v473_v29 = vmul.f32 0.7, %v217_v23  ;;  %598 = vst [vmem:[#allocation8 + $0xc0] sm:$0xff] %v534_v21  ;;  %v346_v33 = vmul.f32 0.2, %v154_v30  ;;  %v155_v38 = vld [vmem:[#allocation5 + $0xe8] sm:$0xff] }
  0x3f   :  { %599 = vst [vmem:[#allocation8 + $0xc8] sm:$0xff] %v535_v26  ;;  %v536_v35 = vadd.f32 %v472_v20, %v408_v27  ;;  %v409_v36 = vadd.f32 %v345_v28, %v281_v24  ;;  %v474_v37 = vmul.f32 0.7, %v218_v31  ;;  %v219_v39 = vld [vmem:[#allocation7 + $0xe8] sm:$0xff]  ;;  %v92_v40 = vld [vmem:[#allocation2 + $0xf0] sm:$0xff]  ;;  %v93_v49 = vld [vmem:[#allocation2 + $0xf8] sm:$0xff] }
  0x40   :  { %v410_v41 = vadd.f32 %v346_v33, %v282_v32  ;;  %v283_v42 = vmul.f32 0.1, %v91_v34  ;;  %v347_v43 = vmul.f32 0.2, %v155_v38  ;;  %v475_v44 = vmul.f32 0.7, %v219_v39 }
  0x41   :  { %600 = vst [vmem:[#allocation8 + $0xd0] sm:$0xff] %v536_v35  ;;  %v537_v45 = vadd.f32 %v473_v29, %v409_v36  ;;  %v156_v46 = vld [vmem:[#allocation5 + $0xf0] sm:$0xff]  ;;  %v284_v48 = vmul.f32 0.1, %v92_v40  ;;  %v157_v54 = vld [vmem:[#allocation5 + $0xf8] sm:$0xff]  ;;  %v94_v58 = vld [vmem:[#allocation2 + $0x100] sm:$0xff] }
  0x42   :  { %v220_v47 = vld [vmem:[#allocation7 + $0xf0] sm:$0xff]  ;;  %v538_v50 = vadd.f32 %v474_v37, %v410_v41  ;;  %v411_v51 = vadd.f32 %v347_v43, %v283_v42  ;;  %v348_v52 = vmul.f32 0.2, %v156_v46  ;;  %v221_v55 = vld [vmem:[#allocation7 + $0xf8] sm:$0xff]  ;;  %v285_v56 = vmul.f32 0.1, %v93_v49 }
  0x43   :  { %v476_v53 = vmul.f32 0.7, %v220_v47  ;;  %601 = vst [vmem:[#allocation8 + $0xd8] sm:$0xff] %v537_v45  ;;  %v349_v57 = vmul.f32 0.2, %v157_v54  ;;  %v158_v62 = vld [vmem:[#allocation5 + $0x100] sm:$0xff] }
  0x44   :  { %602 = vst [vmem:[#allocation8 + $0xe0] sm:$0xff] %v538_v50  ;;  %v539_v59 = vadd.f32 %v475_v44, %v411_v51  ;;  %v412_v60 = vadd.f32 %v348_v52, %v284_v48  ;;  %v477_v61 = vmul.f32 0.7, %v221_v55  ;;  %v222_v63 = vld [vmem:[#allocation7 + $0x100] sm:$0xff]  ;;  %v95_v0 = vld [vmem:[#allocation2 + $0x108] sm:$0xff]  ;;  %v96_v9 = vld [vmem:[#allocation2 + $0x110] sm:$0xff] }
  0x45   :  { %v413_v1 = vadd.f32 %v349_v57, %v285_v56  ;;  %v286_v2 = vmul.f32 0.1, %v94_v58  ;;  %v350_v3 = vmul.f32 0.2, %v158_v62  ;;  %v478_v4 = vmul.f32 0.7, %v222_v63 }
  0x46   :  { %603 = vst [vmem:[#allocation8 + $0xe8] sm:$0xff] %v539_v59  ;;  %v540_v5 = vadd.f32 %v476_v53, %v412_v60  ;;  %v159_v6 = vld [vmem:[#allocation5 + $0x108] sm:$0xff]  ;;  %v287_v8 = vmul.f32 0.1, %v95_v0  ;;  %v160_v14 = vld [vmem:[#allocation5 + $0x110] sm:$0xff]  ;;  %v97_v18 = vld [vmem:[#allocation2 + $0x118] sm:$0xff] }
  0x47   :  { %v223_v7 = vld [vmem:[#allocation7 + $0x108] sm:$0xff]  ;;  %v541_v10 = vadd.f32 %v477_v61, %v413_v1  ;;  %v414_v11 = vadd.f32 %v350_v3, %v286_v2  ;;  %v351_v12 = vmul.f32 0.2, %v159_v6  ;;  %v224_v15 = vld [vmem:[#allocation7 + $0x110] sm:$0xff]  ;;  %v288_v16 = vmul.f32 0.1, %v96_v9 }
  0x48   :  { %v479_v13 = vmul.f32 0.7, %v223_v7  ;;  %604 = vst [vmem:[#allocation8 + $0xf0] sm:$0xff] %v540_v5  ;;  %v352_v17 = vmul.f32 0.2, %v160_v14  ;;  %v161_v22 = vld [vmem:[#allocation5 + $0x118] sm:$0xff] }
  0x49   :  { %605 = vst [vmem:[#allocation8 + $0xf8] sm:$0xff] %v541_v10  ;;  %v542_v19 = vadd.f32 %v478_v4, %v414_v11  ;;  %v415_v20 = vadd.f32 %v351_v12, %v287_v8  ;;  %v480_v21 = vmul.f32 0.7, %v224_v15  ;;  %v225_v23 = vld [vmem:[#allocation7 + $0x118] sm:$0xff]  ;;  %v98_v24 = vld [vmem:[#allocation2 + $0x120] sm:$0xff]  ;;  %v99_v33 = vld [vmem:[#allocation2 + $0x128] sm:$0xff] }
  0x4a   :  { %v416_v25 = vadd.f32 %v352_v17, %v288_v16  ;;  %v289_v26 = vmul.f32 0.1, %v97_v18  ;;  %v353_v27 = vmul.f32 0.2, %v161_v22  ;;  %v481_v28 = vmul.f32 0.7, %v225_v23 }
  0x4b   :  { %606 = vst [vmem:[#allocation8 + $0x100] sm:$0xff] %v542_v19  ;;  %v543_v29 = vadd.f32 %v479_v13, %v415_v20  ;;  %v162_v30 = vld [vmem:[#allocation5 + $0x120] sm:$0xff]  ;;  %v290_v32 = vmul.f32 0.1, %v98_v24  ;;  %v163_v38 = vld [vmem:[#allocation5 + $0x128] sm:$0xff]  ;;  %v100_v42 = vld [vmem:[#allocation2 + $0x130] sm:$0xff] }
  0x4c   :  { %v226_v31 = vld [vmem:[#allocation7 + $0x120] sm:$0xff]  ;;  %v544_v34 = vadd.f32 %v480_v21, %v416_v25  ;;  %v417_v35 = vadd.f32 %v353_v27, %v289_v26  ;;  %v354_v36 = vmul.f32 0.2, %v162_v30  ;;  %v227_v39 = vld [vmem:[#allocation7 + $0x128] sm:$0xff]  ;;  %v291_v40 = vmul.f32 0.1, %v99_v33 }
  0x4d   :  { %v482_v37 = vmul.f32 0.7, %v226_v31  ;;  %607 = vst [vmem:[#allocation8 + $0x108] sm:$0xff] %v543_v29  ;;  %v355_v41 = vmul.f32 0.2, %v163_v38  ;;  %v164_v46 = vld [vmem:[#allocation5 + $0x130] sm:$0xff] }
  0x4e   :  { %608 = vst [vmem:[#allocation8 + $0x110] sm:$0xff] %v544_v34  ;;  %v545_v43 = vadd.f32 %v481_v28, %v417_v35  ;;  %v418_v44 = vadd.f32 %v354_v36, %v290_v32  ;;  %v483_v45 = vmul.f32 0.7, %v227_v39  ;;  %v228_v47 = vld [vmem:[#allocation7 + $0x130] sm:$0xff]  ;;  %v101_v48 = vld [vmem:[#allocation2 + $0x138] sm:$0xff]  ;;  %v102_v57 = vld [vmem:[#allocation2 + $0x140] sm:$0xff] }
  0x4f   :  { %v419_v49 = vadd.f32 %v355_v41, %v291_v40  ;;  %v292_v50 = vmul.f32 0.1, %v100_v42  ;;  %v356_v51 = vmul.f32 0.2, %v164_v46  ;;  %v484_v52 = vmul.f32 0.7, %v228_v47 }
  0x50   :  { %609 = vst [vmem:[#allocation8 + $0x118] sm:$0xff] %v545_v43  ;;  %v546_v53 = vadd.f32 %v482_v37, %v418_v44  ;;  %v165_v54 = vld [vmem:[#allocation5 + $0x138] sm:$0xff]  ;;  %v293_v56 = vmul.f32 0.1, %v101_v48  ;;  %v166_v62 = vld [vmem:[#allocation5 + $0x140] sm:$0xff]  ;;  %v103_v2 = vld [vmem:[#allocation2 + $0x148] sm:$0xff] }
  0x51   :  { %v229_v55 = vld [vmem:[#allocation7 + $0x138] sm:$0xff]  ;;  %v547_v58 = vadd.f32 %v483_v45, %v419_v49  ;;  %v420_v59 = vadd.f32 %v356_v51, %v292_v50  ;;  %v357_v60 = vmul.f32 0.2, %v165_v54  ;;  %v230_v63 = vld [vmem:[#allocation7 + $0x140] sm:$0xff]  ;;  %v294_v0 = vmul.f32 0.1, %v102_v57 }
  0x52   :  { %v485_v61 = vmul.f32 0.7, %v229_v55  ;;  %610 = vst [vmem:[#allocation8 + $0x120] sm:$0xff] %v546_v53  ;;  %v358_v1 = vmul.f32 0.2, %v166_v62  ;;  %v167_v6 = vld [vmem:[#allocation5 + $0x148] sm:$0xff] }
  0x53   :  { %611 = vst [vmem:[#allocation8 + $0x128] sm:$0xff] %v547_v58  ;;  %v548_v3 = vadd.f32 %v484_v52, %v420_v59  ;;  %v421_v4 = vadd.f32 %v357_v60, %v293_v56  ;;  %v486_v5 = vmul.f32 0.7, %v230_v63  ;;  %v231_v7 = vld [vmem:[#allocation7 + $0x148] sm:$0xff]  ;;  %v104_v8 = vld [vmem:[#allocation2 + $0x150] sm:$0xff]  ;;  %v105_v17 = vld [vmem:[#allocation2 + $0x158] sm:$0xff] }
  0x54   :  { %v422_v9 = vadd.f32 %v358_v1, %v294_v0  ;;  %v295_v10 = vmul.f32 0.1, %v103_v2  ;;  %v359_v11 = vmul.f32 0.2, %v167_v6  ;;  %v487_v12 = vmul.f32 0.7, %v231_v7 }
  0x55   :  { %612 = vst [vmem:[#allocation8 + $0x130] sm:$0xff] %v548_v3  ;;  %v549_v13 = vadd.f32 %v485_v61, %v421_v4  ;;  %v168_v14 = vld [vmem:[#allocation5 + $0x150] sm:$0xff]  ;;  %v296_v16 = vmul.f32 0.1, %v104_v8  ;;  %v169_v22 = vld [vmem:[#allocation5 + $0x158] sm:$0xff]  ;;  %v106_v26 = vld [vmem:[#allocation2 + $0x160] sm:$0xff] }
  0x56   :  { %v232_v15 = vld [vmem:[#allocation7 + $0x150] sm:$0xff]  ;;  %v550_v18 = vadd.f32 %v486_v5, %v422_v9  ;;  %v423_v19 = vadd.f32 %v359_v11, %v295_v10  ;;  %v360_v20 = vmul.f32 0.2, %v168_v14  ;;  %v233_v23 = vld [vmem:[#allocation7 + $0x158] sm:$0xff]  ;;  %v297_v24 = vmul.f32 0.1, %v105_v17 }
  0x57   :  { %v488_v21 = vmul.f32 0.7, %v232_v15  ;;  %613 = vst [vmem:[#allocation8 + $0x138] sm:$0xff] %v549_v13  ;;  %v361_v25 = vmul.f32 0.2, %v169_v22  ;;  %v170_v30 = vld [vmem:[#allocation5 + $0x160] sm:$0xff] }
  0x58   :  { %614 = vst [vmem:[#allocation8 + $0x140] sm:$0xff] %v550_v18  ;;  %v551_v27 = vadd.f32 %v487_v12, %v423_v19  ;;  %v424_v28 = vadd.f32 %v360_v20, %v296_v16  ;;  %v489_v29 = vmul.f32 0.7, %v233_v23  ;;  %v234_v31 = vld [vmem:[#allocation7 + $0x160] sm:$0xff]  ;;  %v107_v32 = vld [vmem:[#allocation2 + $0x168] sm:$0xff]  ;;  %v108_v41 = vld [vmem:[#allocation2 + $0x170] sm:$0xff] }
  0x59   :  { %v425_v33 = vadd.f32 %v361_v25, %v297_v24  ;;  %v298_v34 = vmul.f32 0.1, %v106_v26  ;;  %v362_v35 = vmul.f32 0.2, %v170_v30  ;;  %v490_v36 = vmul.f32 0.7, %v234_v31 }
  0x5a   :  { %615 = vst [vmem:[#allocation8 + $0x148] sm:$0xff] %v551_v27  ;;  %v552_v37 = vadd.f32 %v488_v21, %v424_v28  ;;  %v171_v38 = vld [vmem:[#allocation5 + $0x168] sm:$0xff]  ;;  %v299_v40 = vmul.f32 0.1, %v107_v32  ;;  %v172_v46 = vld [vmem:[#allocation5 + $0x170] sm:$0xff]  ;;  %v109_v50 = vld [vmem:[#allocation2 + $0x178] sm:$0xff] }
  0x5b   :  { %v235_v39 = vld [vmem:[#allocation7 + $0x168] sm:$0xff]  ;;  %v553_v42 = vadd.f32 %v489_v29, %v425_v33  ;;  %v426_v43 = vadd.f32 %v362_v35, %v298_v34  ;;  %v363_v44 = vmul.f32 0.2, %v171_v38  ;;  %v236_v47 = vld [vmem:[#allocation7 + $0x170] sm:$0xff]  ;;  %v300_v48 = vmul.f32 0.1, %v108_v41 }
  0x5c   :  { %v491_v45 = vmul.f32 0.7, %v235_v39  ;;  %616 = vst [vmem:[#allocation8 + $0x150] sm:$0xff] %v552_v37  ;;  %v364_v49 = vmul.f32 0.2, %v172_v46  ;;  %v173_v54 = vld [vmem:[#allocation5 + $0x178] sm:$0xff] }
  0x5d   :  { %617 = vst [vmem:[#allocation8 + $0x158] sm:$0xff] %v553_v42  ;;  %v554_v51 = vadd.f32 %v490_v36, %v426_v43  ;;  %v427_v52 = vadd.f32 %v363_v44, %v299_v40  ;;  %v492_v53 = vmul.f32 0.7, %v236_v47  ;;  %v237_v55 = vld [vmem:[#allocation7 + $0x178] sm:$0xff]  ;;  %v110_v56 = vld [vmem:[#allocation2 + $0x180] sm:$0xff]  ;;  %v111_v1 = vld [vmem:[#allocation2 + $0x188] sm:$0xff] }
  0x5e   :  { %v428_v57 = vadd.f32 %v364_v49, %v300_v48  ;;  %v301_v58 = vmul.f32 0.1, %v109_v50  ;;  %v365_v59 = vmul.f32 0.2, %v173_v54  ;;  %v493_v60 = vmul.f32 0.7, %v237_v55 }
  0x5f   :  { %618 = vst [vmem:[#allocation8 + $0x160] sm:$0xff] %v554_v51  ;;  %v555_v61 = vadd.f32 %v491_v45, %v427_v52  ;;  %v174_v62 = vld [vmem:[#allocation5 + $0x180] sm:$0xff]  ;;  %v302_v0 = vmul.f32 0.1, %v110_v56  ;;  %v175_v6 = vld [vmem:[#allocation5 + $0x188] sm:$0xff]  ;;  %v112_v10 = vld [vmem:[#allocation2 + $0x190] sm:$0xff] }
  0x60   :  { %v238_v63 = vld [vmem:[#allocation7 + $0x180] sm:$0xff]  ;;  %v556_v2 = vadd.f32 %v492_v53, %v428_v57  ;;  %v429_v3 = vadd.f32 %v365_v59, %v301_v58  ;;  %v366_v4 = vmul.f32 0.2, %v174_v62  ;;  %v239_v7 = vld [vmem:[#allocation7 + $0x188] sm:$0xff]  ;;  %v303_v8 = vmul.f32 0.1, %v111_v1 }
  0x61   :  { %v494_v5 = vmul.f32 0.7, %v238_v63  ;;  %619 = vst [vmem:[#allocation8 + $0x168] sm:$0xff] %v555_v61  ;;  %v367_v9 = vmul.f32 0.2, %v175_v6  ;;  %v176_v14 = vld [vmem:[#allocation5 + $0x190] sm:$0xff] }
  0x62   :  { %620 = vst [vmem:[#allocation8 + $0x170] sm:$0xff] %v556_v2  ;;  %v557_v11 = vadd.f32 %v493_v60, %v429_v3  ;;  %v430_v12 = vadd.f32 %v366_v4, %v302_v0  ;;  %v495_v13 = vmul.f32 0.7, %v239_v7  ;;  %v240_v15 = vld [vmem:[#allocation7 + $0x190] sm:$0xff]  ;;  %v113_v16 = vld [vmem:[#allocation2 + $0x198] sm:$0xff]  ;;  %v114_v25 = vld [vmem:[#allocation2 + $0x1a0] sm:$0xff] }
  0x63   :  { %v431_v17 = vadd.f32 %v367_v9, %v303_v8  ;;  %v304_v18 = vmul.f32 0.1, %v112_v10  ;;  %v368_v19 = vmul.f32 0.2, %v176_v14  ;;  %v496_v20 = vmul.f32 0.7, %v240_v15 }
  0x64   :  { %621 = vst [vmem:[#allocation8 + $0x178] sm:$0xff] %v557_v11  ;;  %v558_v21 = vadd.f32 %v494_v5, %v430_v12  ;;  %v177_v22 = vld [vmem:[#allocation5 + $0x198] sm:$0xff]  ;;  %v305_v24 = vmul.f32 0.1, %v113_v16  ;;  %v178_v30 = vld [vmem:[#allocation5 + $0x1a0] sm:$0xff]  ;;  %v115_v34 = vld [vmem:[#allocation2 + $0x1a8] sm:$0xff] }
  0x65   :  { %v241_v23 = vld [vmem:[#allocation7 + $0x198] sm:$0xff]  ;;  %v559_v26 = vadd.f32 %v495_v13, %v431_v17  ;;  %v432_v27 = vadd.f32 %v368_v19, %v304_v18  ;;  %v369_v28 = vmul.f32 0.2, %v177_v22  ;;  %v242_v31 = vld [vmem:[#allocation7 + $0x1a0] sm:$0xff]  ;;  %v306_v32 = vmul.f32 0.1, %v114_v25 }
  0x66   :  { %v497_v29 = vmul.f32 0.7, %v241_v23  ;;  %622 = vst [vmem:[#allocation8 + $0x180] sm:$0xff] %v558_v21  ;;  %v370_v33 = vmul.f32 0.2, %v178_v30  ;;  %v179_v38 = vld [vmem:[#allocation5 + $0x1a8] sm:$0xff] }
  0x67   :  { %623 = vst [vmem:[#allocation8 + $0x188] sm:$0xff] %v559_v26  ;;  %v560_v35 = vadd.f32 %v496_v20, %v432_v27  ;;  %v433_v36 = vadd.f32 %v369_v28, %v305_v24  ;;  %v498_v37 = vmul.f32 0.7, %v242_v31  ;;  %v243_v39 = vld [vmem:[#allocation7 + $0x1a8] sm:$0xff]  ;;  %v116_v40 = vld [vmem:[#allocation2 + $0x1b0] sm:$0xff]  ;;  %v117_v49 = vld [vmem:[#allocation2 + $0x1b8] sm:$0xff] }
  0x68   :  { %v434_v41 = vadd.f32 %v370_v33, %v306_v32  ;;  %v307_v42 = vmul.f32 0.1, %v115_v34  ;;  %v371_v43 = vmul.f32 0.2, %v179_v38  ;;  %v499_v44 = vmul.f32 0.7, %v243_v39 }
  0x69   :  { %624 = vst [vmem:[#allocation8 + $0x190] sm:$0xff] %v560_v35  ;;  %v561_v45 = vadd.f32 %v497_v29, %v433_v36  ;;  %v180_v46 = vld [vmem:[#allocation5 + $0x1b0] sm:$0xff]  ;;  %v308_v48 = vmul.f32 0.1, %v116_v40  ;;  %v181_v54 = vld [vmem:[#allocation5 + $0x1b8] sm:$0xff]  ;;  %v118_v58 = vld [vmem:[#allocation2 + $0x1c0] sm:$0xff] }
  0x6a   :  { %v244_v47 = vld [vmem:[#allocation7 + $0x1b0] sm:$0xff]  ;;  %v562_v50 = vadd.f32 %v498_v37, %v434_v41  ;;  %v435_v51 = vadd.f32 %v371_v43, %v307_v42  ;;  %v372_v52 = vmul.f32 0.2, %v180_v46  ;;  %v245_v55 = vld [vmem:[#allocation7 + $0x1b8] sm:$0xff]  ;;  %v309_v56 = vmul.f32 0.1, %v117_v49 }
  0x6b   :  { %v500_v53 = vmul.f32 0.7, %v244_v47  ;;  %625 = vst [vmem:[#allocation8 + $0x198] sm:$0xff] %v561_v45  ;;  %v373_v57 = vmul.f32 0.2, %v181_v54  ;;  %v182_v62 = vld [vmem:[#allocation5 + $0x1c0] sm:$0xff] }
  0x6c   :  { %626 = vst [vmem:[#allocation8 + $0x1a0] sm:$0xff] %v562_v50  ;;  %v563_v59 = vadd.f32 %v499_v44, %v435_v51  ;;  %v436_v60 = vadd.f32 %v372_v52, %v308_v48  ;;  %v501_v61 = vmul.f32 0.7, %v245_v55  ;;  %v246_v63 = vld [vmem:[#allocation7 + $0x1c0] sm:$0xff]  ;;  %v119_v0 = vld [vmem:[#allocation2 + $0x1c8] sm:$0xff]  ;;  %v120_v9 = vld [vmem:[#allocation2 + $0x1d0] sm:$0xff] }
  0x6d   :  { %v437_v1 = vadd.f32 %v373_v57, %v309_v56  ;;  %v310_v2 = vmul.f32 0.1, %v118_v58  ;;  %v374_v3 = vmul.f32 0.2, %v182_v62  ;;  %v502_v4 = vmul.f32 0.7, %v246_v63 }
  0x6e   :  { %627 = vst [vmem:[#allocation8 + $0x1a8] sm:$0xff] %v563_v59  ;;  %v564_v5 = vadd.f32 %v500_v53, %v436_v60  ;;  %v183_v6 = vld [vmem:[#allocation5 + $0x1c8] sm:$0xff]  ;;  %v311_v8 = vmul.f32 0.1, %v119_v0  ;;  %v184_v14 = vld [vmem:[#allocation5 + $0x1d0] sm:$0xff]  ;;  %v121_v18 = vld [vmem:[#allocation2 + $0x1d8] sm:$0xff] }
  0x6f   :  { %v247_v7 = vld [vmem:[#allocation7 + $0x1c8] sm:$0xff]  ;;  %v565_v10 = vadd.f32 %v501_v61, %v437_v1  ;;  %v438_v11 = vadd.f32 %v374_v3, %v310_v2  ;;  %v375_v12 = vmul.f32 0.2, %v183_v6  ;;  %v248_v15 = vld [vmem:[#allocation7 + $0x1d0] sm:$0xff]  ;;  %v312_v16 = vmul.f32 0.1, %v120_v9 }
  0x70   :  { %v503_v13 = vmul.f32 0.7, %v247_v7  ;;  %628 = vst [vmem:[#allocation8 + $0x1b0] sm:$0xff] %v564_v5  ;;  %v376_v17 = vmul.f32 0.2, %v184_v14  ;;  %v185_v22 = vld [vmem:[#allocation5 + $0x1d8] sm:$0xff] }
  0x71   :  { %629 = vst [vmem:[#allocation8 + $0x1b8] sm:$0xff] %v565_v10  ;;  %v566_v19 = vadd.f32 %v502_v4, %v438_v11  ;;  %v439_v20 = vadd.f32 %v375_v12, %v311_v8  ;;  %v504_v21 = vmul.f32 0.7, %v248_v15  ;;  %v249_v23 = vld [vmem:[#allocation7 + $0x1d8] sm:$0xff]  ;;  %v122_v24 = vld [vmem:[#allocation2 + $0x1e0] sm:$0xff]  ;;  %v123_v33 = vld [vmem:[#allocation2 + $0x1e8] sm:$0xff] }
  0x72   :  { %v440_v25 = vadd.f32 %v376_v17, %v312_v16  ;;  %v313_v26 = vmul.f32 0.1, %v121_v18  ;;  %v377_v27 = vmul.f32 0.2, %v185_v22  ;;  %v505_v28 = vmul.f32 0.7, %v249_v23 }
  0x73   :  { %630 = vst [vmem:[#allocation8 + $0x1c0] sm:$0xff] %v566_v19  ;;  %v567_v29 = vadd.f32 %v503_v13, %v439_v20  ;;  %v186_v30 = vld [vmem:[#allocation5 + $0x1e0] sm:$0xff]  ;;  %v314_v32 = vmul.f32 0.1, %v122_v24  ;;  %v187_v38 = vld [vmem:[#allocation5 + $0x1e8] sm:$0xff]  ;;  %v124_v42 = vld [vmem:[#allocation2 + $0x1f0] sm:$0xff] }
  0x74   :  { %v250_v31 = vld [vmem:[#allocation7 + $0x1e0] sm:$0xff]  ;;  %v568_v34 = vadd.f32 %v504_v21, %v440_v25  ;;  %v441_v35 = vadd.f32 %v377_v27, %v313_v26  ;;  %v378_v36 = vmul.f32 0.2, %v186_v30  ;;  %v251_v39 = vld [vmem:[#allocation7 + $0x1e8] sm:$0xff]  ;;  %v315_v40 = vmul.f32 0.1, %v123_v33 }
  0x75   :  { %v506_v37 = vmul.f32 0.7, %v250_v31  ;;  %631 = vst [vmem:[#allocation8 + $0x1c8] sm:$0xff] %v567_v29  ;;  %v379_v41 = vmul.f32 0.2, %v187_v38  ;;  %v188_v46 = vld [vmem:[#allocation5 + $0x1f0] sm:$0xff] }
  0x76   :  { %632 = vst [vmem:[#allocation8 + $0x1d0] sm:$0xff] %v568_v34  ;;  %v569_v43 = vadd.f32 %v505_v28, %v441_v35  ;;  %v442_v44 = vadd.f32 %v378_v36, %v314_v32  ;;  %v507_v45 = vmul.f32 0.7, %v251_v39  ;;  %v252_v47 = vld [vmem:[#allocation7 + $0x1f0] sm:$0xff]  ;;  %v125_v48 = vld [vmem:[#allocation2 + $0x1f8] sm:$0xff] }
  0x77   :  { %v443_v49 = vadd.f32 %v379_v41, %v315_v40  ;;  %v316_v50 = vmul.f32 0.1, %v124_v42  ;;  %v380_v51 = vmul.f32 0.2, %v188_v46  ;;  %v508_v52 = vmul.f32 0.7, %v252_v47 }
  0x78   :  { %633 = vst [vmem:[#allocation8 + $0x1d8] sm:$0xff] %v569_v43  ;;  %v570_v53 = vadd.f32 %v506_v37, %v442_v44  ;;  %v189_v54 = vld [vmem:[#allocation5 + $0x1f8] sm:$0xff]  ;;  %v317_v56 = vmul.f32 0.1, %v125_v48 }
  0x79   :  { %v253_v55 = vld [vmem:[#allocation7 + $0x1f8] sm:$0xff]  ;;  %v571_v57 = vadd.f32 %v507_v45, %v443_v49  ;;  %v444_v58 = vadd.f32 %v380_v51, %v316_v50  ;;  %v381_v59 = vmul.f32 0.2, %v189_v54 }
  0x7a   :  { %v509_v60 = vmul.f32 0.7, %v253_v55  ;;  %634 = vst [vmem:[#allocation8 + $0x1e0] sm:$0xff] %v570_v53 }
  0x7b   :  { %635 = vst [vmem:[#allocation8 + $0x1e8] sm:$0xff] %v571_v57  ;;  %v572_v61 = vadd.f32 %v508_v52, %v444_v58  ;;  %v445_v62 = vadd.f32 %v381_v59, %v317_v56 }
  0x7d   :  { %636 = vst [vmem:[#allocation8 + $0x1f0] sm:$0xff] %v572_v61  ;;  %v573_v63 = vadd.f32 %v509_v60, %v445_v62 }
  0x7f   :  { %637 = vst [vmem:[#allocation8 + $0x1f8] sm:$0xff] %v573_v63 }
  0x80   :  { %650 = dma.vmem_to_hbm [thread:$0]  %s643_s27, 8192, %s645_s30, [#allocation4], %s767_s20, %s767_s20, %s768_s21  }
  0x81   :  { %764 = dma.done.wait [#allocation4], 8192  }
  0x82   :  { %765 = vsyncadd [#allocation4], 4294959104 }
  0x83   :  { %655 = vsyncpa [#allocation3], 1 }
  0x84   :  { %656 = vsyncpa [#allocation6], 1 }
  0x85   :  { %657 = vsyncpa [#allocation4], 1 }

</bundles_post_ra>
